<compile_context>
chip_gen: v5e
topology: v5e:2x2
jax: 0.10.0
libtpu: 0.0.40
codegen_flags: <defaults>
</compile_context>

<pallas_src>
import functools

import jax
import jax.numpy as jnp
from jax.experimental import pallas as pl
from jax.experimental.pallas import tpu as pltpu

LANE = 128      # lane width (last-dim alignment)
SUBLANE_BF16 = 16   # bf16 sublane pack (rows); also satisfies f32's 8-row rule


def _round_up(n, m):
    return ((n + m - 1) // m) * m


def mlp_kernel(x_ref, w1_ref, b1_ref, w2_ref, b2_ref, w3_ref, b3_ref, o_ref):
    # One batch tile per grid step; all three matmuls fused, weights VMEM-resident.
    # bf16 operands on the MXU, f32 accumulation / bias-add / ReLU on the VPU.
    x = x_ref[...].astype(jnp.bfloat16)                                  # (TILE_B, In_p)
    h1 = jnp.dot(x, w1_ref[...], preferred_element_type=jnp.float32) + b1_ref[...]
    h1 = jnp.maximum(h1, 0.0)                                            # ReLU (f32 VPU)
    h2 = jnp.dot(h1.astype(jnp.bfloat16), w2_ref[...],
                 preferred_element_type=jnp.float32) + b2_ref[...]
    h2 = jnp.maximum(h2, 0.0)                                            # ReLU
    out = jnp.dot(h2.astype(jnp.bfloat16), w3_ref[...],
                  preferred_element_type=jnp.float32) + b3_ref[...]
    o_ref[...] = out.astype(o_ref.dtype)                                 # lane-dense store


def prepare_params(params):
    """Pad every parameter to TPU tile alignment and cast weights to bf16, ONCE.

    Call this at init time and reuse the result for every forward call; the padded
    zeros are mathematically inert through matmul + bias + ReLU.
    Weights are stored (in, out) so the kernel computes x @ W + b directly.
    """
    w1, b1, w2, b2, w3, b3 = (params["w1"], params["b1"], params["w2"],
                              params["b2"], params["w3"], params["b3"])
    In, H = w1.shape
    C = w3.shape[1]
    In_p, H_p, C_p = _round_up(In, LANE), _round_up(H, LANE), _round_up(C, LANE)

    bf16, f32 = jnp.bfloat16, jnp.float32
    return dict(
        w1=jnp.zeros((In_p, H_p), bf16).at[:In, :H].set(w1.astype(bf16)),
        b1=jnp.zeros((1, H_p), f32).at[:, :H].set(b1.astype(f32)),
        w2=jnp.zeros((H_p, H_p), bf16).at[:H, :H].set(w2.astype(bf16)),
        b2=jnp.zeros((1, H_p), f32).at[:, :H].set(b2.astype(f32)),
        w3=jnp.zeros((H_p, C_p), bf16).at[:H, :C].set(w3.astype(bf16)),
        b3=jnp.zeros((1, C_p), f32).at[:, :C].set(b3.astype(f32)),
    )


def _choose_tile_b(B, tile_b):
    """Pick a batch tile: 16-row aligned (bf16 sublane pack), capped at the batch,
    and split into >=2 grid steps when the batch allows it (v7x 2nd TensorCore)."""
    B_aligned = _round_up(B, SUBLANE_BF16)
    tile = min(_round_up(tile_b, SUBLANE_BF16), B_aligned)
    if B_aligned >= 2 * SUBLANE_BF16 and tile >= B_aligned:
        tile = _round_up(B_aligned // 2, SUBLANE_BF16)
    return tile


@functools.partial(jax.jit, static_argnames=("num_classes", "tile_b"))
def neural_net_forward(x, padded, *, num_classes, tile_b=512):
    """x: (B, input_size) f32. padded: output of prepare_params (bf16 weights,
    f32 biases, already lane-padded). Returns (B, num_classes) f32 logits."""
    B, In = x.shape
    In_p, H_p = padded["w1"].shape
    C_p = padded["w3"].shape[1]

    tile = _choose_tile_b(B, tile_b)
    B_p = _round_up(B, tile)

    # Only the activation gets padded per call (zero rows/cols are inert).
    xp = jnp.zeros((B_p, In_p), jnp.float32).at[:B, :In].set(x.astype(jnp.float32))

    # Weights/biases: constant index_map -> resident in VMEM across batch tiles.
    const = lambda shape: pl.BlockSpec(shape, lambda i: tuple(0 for _ in shape))

    out_padded = pl.pallas_call(
        mlp_kernel,
        out_shape=jax.ShapeDtypeStruct((B_p, C_p), jnp.float32),
        grid_spec=pl.GridSpec(
            grid=(B_p // tile,),
            in_specs=[
                pl.BlockSpec((tile, In_p), lambda i: (i, 0)),   # x: tiled over batch
                const((In_p, H_p)), const((1, H_p)),
                const((H_p, H_p)), const((1, H_p)),
                const((H_p, C_p)), const((1, C_p)),
            ],
            out_specs=pl.BlockSpec((tile, C_p), lambda i: (i, 0)),
        ),
        compiler_params=pltpu.CompilerParams(
            dimension_semantics=("parallel",),   # both TCs on v7x; no-op on v5e/v6e
        ),
    )(xp, padded["w1"], padded["b1"], padded["w2"], padded["b2"],
      padded["w3"], padded["b3"])

    return out_padded[:B, :num_classes]


def init_params(key, input_size, hidden_size, num_classes):
    """Deterministic init. PyTorch nn.Linear stores W as (out, in); we store the
    transpose (in, out) so the kernel computes x @ W + b directly (same math)."""
    ks = jax.random.split(key, 6)

    def linear(kw, kb, fan_in, fan_out):
        bound = 1.0 / jnp.sqrt(fan_in)
        w = jax.random.uniform(kw, (fan_in, fan_out), jnp.float32, -bound, bound)
        b = jax.random.uniform(kb, (1, fan_out), jnp.float32, -bound, bound)
        return w, b

    w1, b1 = linear(ks[0], ks[1], input_size, hidden_size)
    w2, b2 = linear(ks[2], ks[3], hidden_size, hidden_size)
    w3, b3 = linear(ks[4], ks[5], hidden_size, num_classes)
    return dict(w1=w1, b1=b1, w2=w2, b2=b2, w3=w3, b3=b3)


def _reference(x, p):
    h = jnp.maximum(x @ p["w1"] + p["b1"], 0.0)
    h = jnp.maximum(h @ p["w2"] + p["b2"], 0.0)
    return h @ p["w3"] + p["b3"]


if __name__ == "__main__":
    # Small shapes consistent with the module: bag-of-words input -> hidden=8 -> classes.
    input_size = 32      # stand-in for len(all_words)
    hidden_size = 8
    num_classes = 4      # stand-in for number of intent tags

    key = jax.random.PRNGKey(0)
    k_x1, k_x2, k_p = jax.random.split(key, 3)
    params = init_params(k_p, input_size, hidden_size, num_classes)
    padded = prepare_params(params)     # pad + bf16-cast ONCE, reused every call

    # Case 1: tiny batch (as in the original module's usage).
    x_small = jax.random.uniform(k_x1, (2, input_size), jnp.float32)
    out_small = jax.block_until_ready(
        neural_net_forward(x_small, padded, num_classes=num_classes))
    assert out_small.shape == (2, num_classes)
    ref_small = _reference(x_small, params)
    # bf16 matmul operands (f32 accumulation) -> looser tolerance vs f32 reference.
    assert jnp.allclose(out_small, ref_small, rtol=2e-2, atol=2e-2), "mismatch (B=2)"

    # Case 2: larger batch exercising a multi-step batch grid (weights stay
    # VMEM-resident across tiles, activation DMA double-buffered, >=2 grid steps).
    x_big = jax.random.uniform(k_x2, (64, input_size), jnp.float32)
    out_big = jax.block_until_ready(
        neural_net_forward(x_big, padded, num_classes=num_classes, tile_b=32))
    assert out_big.shape == (64, num_classes)
    ref_big = _reference(x_big, params)
    assert jnp.allclose(out_big, ref_big, rtol=2e-2, atol=2e-2), "mismatch (B=64)"

    print("KERNEL_OK")
</pallas_src>

<mosaic_0001>
module attributes {stable_mosaic.version = 11 : i64} {
  func.func @mlp_kernel(%arg0: i32, %arg1: memref<16x128xf32, #tpu.memory_space<vmem>>, %arg2: memref<128x128xbf16, #tpu.memory_space<vmem>>, %arg3: memref<1x128xf32, #tpu.memory_space<vmem>>, %arg4: memref<128x128xbf16, #tpu.memory_space<vmem>>, %arg5: memref<1x128xf32, #tpu.memory_space<vmem>>, %arg6: memref<128x128xbf16, #tpu.memory_space<vmem>>, %arg7: memref<1x128xf32, #tpu.memory_space<vmem>>, %arg8: memref<16x128xf32, #tpu.memory_space<vmem>>) attributes {dimension_semantics = [#tpu.dimension_semantics<parallel>], iteration_bounds = array<i64: 1>, scalar_prefetch = 0 : i64, scratch_operands = 0 : i64, tpu.core_type = #tpu.core_type<tc>, window_params = [{transform_indices = @transform_0, window_bounds = array<i64: 16, 128>}, {pipeline_mode = #tpu.pipeline_mode<synchronous>, transform_indices = @transform_1, window_bounds = array<i64: 128, 128>}, {pipeline_mode = #tpu.pipeline_mode<synchronous>, transform_indices = @transform_2, window_bounds = array<i64: 1, 128>}, {pipeline_mode = #tpu.pipeline_mode<synchronous>, transform_indices = @transform_3, window_bounds = array<i64: 128, 128>}, {pipeline_mode = #tpu.pipeline_mode<synchronous>, transform_indices = @transform_4, window_bounds = array<i64: 1, 128>}, {pipeline_mode = #tpu.pipeline_mode<synchronous>, transform_indices = @transform_5, window_bounds = array<i64: 128, 128>}, {pipeline_mode = #tpu.pipeline_mode<synchronous>, transform_indices = @transform_6, window_bounds = array<i64: 1, 128>}, {transform_indices = @transform_7, window_bounds = array<i64: 16, 128>}]} {
    %c0 = arith.constant 0 : index
    %c0_0 = arith.constant 0 : index
    %0 = vector.load %arg1[%c0, %c0_0] : memref<16x128xf32, #tpu.memory_space<vmem>>, vector<16x128xf32>
    %1 = arith.truncf %0 : vector<16x128xf32> to vector<16x128xbf16>
    %c0_1 = arith.constant 0 : index
    %c0_2 = arith.constant 0 : index
    %2 = vector.load %arg2[%c0_1, %c0_2] : memref<128x128xbf16, #tpu.memory_space<vmem>>, vector<128x128xbf16>
    %cst = arith.constant dense<0.000000e+00> : vector<16x128xf32>
    %3 = tpu.matmul %1, %2, %cst {dimension_numbers = #tpu.dot_dimension_numbers<[1], [0], [0], [1], [0, 0, 1, 1], [], []>} : vector<16x128xbf16>, vector<128x128xbf16>, vector<16x128xf32> -> vector<16x128xf32>
    %c0_3 = arith.constant 0 : index
    %c0_4 = arith.constant 0 : index
    %4 = vector.load %arg3[%c0_3, %c0_4] : memref<1x128xf32, #tpu.memory_space<vmem>>, vector<1x128xf32>
    %5 = vector.broadcast %4 : vector<1x128xf32> to vector<16x128xf32>
    %6 = arith.addf %3, %5 : vector<16x128xf32>
    %cst_5 = arith.constant 0.000000e+00 : f32
    %7 = vector.broadcast %cst_5 : f32 to vector<16x128xf32>
    %8 = arith.maximumf %6, %7 : vector<16x128xf32>
    %9 = arith.truncf %8 : vector<16x128xf32> to vector<16x128xbf16>
    %c0_6 = arith.constant 0 : index
    %c0_7 = arith.constant 0 : index
    %10 = vector.load %arg4[%c0_6, %c0_7] : memref<128x128xbf16, #tpu.memory_space<vmem>>, vector<128x128xbf16>
    %cst_8 = arith.constant dense<0.000000e+00> : vector<16x128xf32>
    %11 = tpu.matmul %9, %10, %cst_8 {dimension_numbers = #tpu.dot_dimension_numbers<[1], [0], [0], [1], [0, 0, 1, 1], [], []>} : vector<16x128xbf16>, vector<128x128xbf16>, vector<16x128xf32> -> vector<16x128xf32>
    %c0_9 = arith.constant 0 : index
    %c0_10 = arith.constant 0 : index
    %12 = vector.load %arg5[%c0_9, %c0_10] : memref<1x128xf32, #tpu.memory_space<vmem>>, vector<1x128xf32>
    %13 = vector.broadcast %12 : vector<1x128xf32> to vector<16x128xf32>
    %14 = arith.addf %11, %13 : vector<16x128xf32>
    %cst_11 = arith.constant 0.000000e+00 : f32
    %15 = vector.broadcast %cst_11 : f32 to vector<16x128xf32>
    %16 = arith.maximumf %14, %15 : vector<16x128xf32>
    %17 = arith.truncf %16 : vector<16x128xf32> to vector<16x128xbf16>
    %c0_12 = arith.constant 0 : index
    %c0_13 = arith.constant 0 : index
    %18 = vector.load %arg6[%c0_12, %c0_13] : memref<128x128xbf16, #tpu.memory_space<vmem>>, vector<128x128xbf16>
    %cst_14 = arith.constant dense<0.000000e+00> : vector<16x128xf32>
    %19 = tpu.matmul %17, %18, %cst_14 {dimension_numbers = #tpu.dot_dimension_numbers<[1], [0], [0], [1], [0, 0, 1, 1], [], []>} : vector<16x128xbf16>, vector<128x128xbf16>, vector<16x128xf32> -> vector<16x128xf32>
    %c0_15 = arith.constant 0 : index
    %c0_16 = arith.constant 0 : index
    %20 = vector.load %arg7[%c0_15, %c0_16] : memref<1x128xf32, #tpu.memory_space<vmem>>, vector<1x128xf32>
    %21 = vector.broadcast %20 : vector<1x128xf32> to vector<16x128xf32>
    %22 = arith.addf %19, %21 : vector<16x128xf32>
    %c0_17 = arith.constant 0 : index
    %c0_18 = arith.constant 0 : index
    %23 = vector.load %arg8[%c0_17, %c0_18] : memref<16x128xf32, #tpu.memory_space<vmem>>, vector<16x128xf32>
    tpu.vector_store %arg8[%c0_17, %c0_18], %22 {strides = array<i32>} : memref<16x128xf32, #tpu.memory_space<vmem>>, vector<16x128xf32>,
    return
  }
  func.func @transform_0(%arg0: i32) -> (i32, i32) {
    %c0_i32 = arith.constant 0 : i32
    %c0_i32_0 = arith.constant 0 : i32
    return %arg0, %c0_i32 : i32, i32
  }
  func.func @transform_1(%arg0: i32) -> (i32, i32) {
    %c0_i32 = arith.constant 0 : i32
    %c0_i32_0 = arith.constant 0 : i32
    %c0_i32_1 = arith.constant 0 : i32
    return %c0_i32, %c0_i32_0 : i32, i32
  }
  func.func @transform_2(%arg0: i32) -> (i32, i32) {
    %c0_i32 = arith.constant 0 : i32
    %c0_i32_0 = arith.constant 0 : i32
    %c0_i32_1 = arith.constant 0 : i32
    return %c0_i32, %c0_i32_0 : i32, i32
  }
  func.func @transform_3(%arg0: i32) -> (i32, i32) {
    %c0_i32 = arith.constant 0 : i32
    %c0_i32_0 = arith.constant 0 : i32
    %c0_i32_1 = arith.constant 0 : i32
    return %c0_i32, %c0_i32_0 : i32, i32
  }
  func.func @transform_4(%arg0: i32) -> (i32, i32) {
    %c0_i32 = arith.constant 0 : i32
    %c0_i32_0 = arith.constant 0 : i32
    %c0_i32_1 = arith.constant 0 : i32
    return %c0_i32, %c0_i32_0 : i32, i32
  }
  func.func @transform_5(%arg0: i32) -> (i32, i32) {
    %c0_i32 = arith.constant 0 : i32
    %c0_i32_0 = arith.constant 0 : i32
    %c0_i32_1 = arith.constant 0 : i32
    return %c0_i32, %c0_i32_0 : i32, i32
  }
  func.func @transform_6(%arg0: i32) -> (i32, i32) {
    %c0_i32 = arith.constant 0 : i32
    %c0_i32_0 = arith.constant 0 : i32
    %c0_i32_1 = arith.constant 0 : i32
    return %c0_i32, %c0_i32_0 : i32, i32
  }
  func.func @transform_7(%arg0: i32) -> (i32, i32) {
    %c0_i32 = arith.constant 0 : i32
    %c0_i32_0 = arith.constant 0 : i32
    return %arg0, %c0_i32 : i32, i32
  }
}

</mosaic_0001>

<bundles_post_ra>
// kernel: neural_net_forward.1
= control target key start
LH: loop header
LB: loop body
LE: loop exit
PB: predicated region body
PF: predicated region fallthrough
CT: control target
= control target key end

     0   :  { %12 = vsyncpa [#allocation3], 0  ;;  %s615_s0 = inlined_call_operand.vmem [shape: f32[16,128], index: 0, kind: input, shape index: {}]   ;;  %s616_s1 = inlined_call_operand.hbm [shape: bf16[128,128], index: 1, kind: input, shape index: {}]   ;;  %s617_s2 = inlined_call_operand.vmem [shape: f32[1,128], index: 2, kind: input, shape index: {}]   ;;  %s618_s3 = inlined_call_operand.hbm [shape: bf16[128,128], index: 3, kind: input, shape index: {}]   ;;  %s619_s4 = inlined_call_operand.vmem [shape: f32[1,128], index: 4, kind: input, shape index: {}]   ;;  %s620_s5 = inlined_call_operand.hbm [shape: bf16[128,128], index: 5, kind: input, shape index: {}]   ;;  %s621_s6 = inlined_call_operand.vmem [shape: f32[1,128], index: 6, kind: input, shape index: {}]   ;;  %s622_s7 = inlined_call_operand.vmem [shape: f32[16,128], index: 7, kind: output, shape index: {}]  }
   0x1   :  { %13 = vsyncpa [#allocation5], 0  ;;  %s35_s26 = sshll.u32 %s618_s3, 4  ;;  %s540_s27 = smov [#allocation4]   ;;  %s36_s26 = int_to_ptr.hbm [resolvable:$true] %s35_s26 }
   0x2   :  { %s37_s28 = sshll.u32 %s540_s27, 4  ;;  %s20_s8 = sshll.u32 %s616_s1, 4  ;;  %s38_s28 = int_to_ptr.vmem [resolvable:$true] %s37_s28  ;;  %s21_s8 = int_to_ptr.hbm [resolvable:$true] %s20_s8 }
   0x3   :  { %s541_s9 = smov 64   ;;  %s542_s10 = smov 4  }
   0x4   :  { %43 = dma.hbm_to_vmem [thread:$0]  %s36_s26, 1024, %s38_s28, [#allocation5], %s541_s9, %s541_s9, %s542_s10  }
   0x5   :  { %s543_s11 = smov [#allocation2]   ;;  %s50_s15 = sshll.u32 %s620_s5, 4  ;;  %s51_s15 = int_to_ptr.hbm [resolvable:$true] %s50_s15 }
   0x6   :  { %s22_s12 = sshll.u32 %s543_s11, 4  ;;  %s544_s3 = smov [#allocation6]   ;;  %s23_s12 = int_to_ptr.vmem [resolvable:$true] %s22_s12 }
   0x7   :  { %28 = dma.hbm_to_vmem [thread:$0]  %s21_s8, 1024, %s23_s12, [#allocation3], %s541_s9, %s541_s9, %s542_s10  }
   0x8   :  { %s52_s16 = sshll.u32 %s544_s3, 4  ;;  %s53_s16 = int_to_ptr.vmem [resolvable:$true] %s52_s16 }
   0x9   :  { %58 = dma.hbm_to_vmem [thread:$0]  %s51_s15, 1024, %s53_s16, [#allocation5], %s541_s9, %s541_s9, %s542_s10  }
   0xa   :  { %536 = dma.done.wait [#allocation3], 1024  }
   0xb   :  { %537 = vsyncadd [#allocation3], 4294966272 }
   0xc   :  { %538 = dma.done.wait [#allocation5], 2048  }
   0xd   :  { %539 = vsyncadd [#allocation5], 4294965248  ;;  %v439_v0 = vld [vmem:[#allocation2 + $0x38] sm:$0xff]  ;;  %v438_v1 = vld [vmem:[#allocation2 + $0x30] sm:$0xff] }
   0xe   :  { %144 = vmatpush.bf16.msra.mxu0 %v439_v0  ;;  %v447_v2 = vld [vmem:[#allocation4 + $0x38] sm:$0xff]  ;;  %v446_v3 = vld [vmem:[#allocation4 + $0x30] sm:$0xff]  ;;  %v437_v4 = vld [vmem:[#allocation2 + $0x28] sm:$0xff] }
   0xf   :  { %229 = vmatpush.bf16.msra.mxu1 %v447_v2  ;;  %v445_v5 = vld [vmem:[#allocation4 + $0x28] sm:$0xff]  ;;  %v436_v6 = vld [vmem:[#allocation2 + $0x20] sm:$0xff]  ;;  %v435_v8 = vld [vmem:[#allocation2 + $0x18] sm:$0xff] }
  0x10   :  { %v444_v7 = vld [vmem:[#allocation4 + $0x20] sm:$0xff]  ;;  %v434_v9 = vld [vmem:[#allocation2 + $0x10] sm:$0xff]  ;;  %v433_v10 = vld [vmem:[#allocation2 + $0x8] sm:$0xff] }
  0x11   :  { %v432_v11 = vld [vmem:[#allocation2] sm:$0xff]  ;;  %v74_v13 = vld [vmem:[%s615_s0 + $0x8] sm:$0xff]  ;;  %v443_v15 = vld [vmem:[#allocation4 + $0x18] sm:$0xff] }
  0x12   :  { %145 = vmatpush.bf16.msra.mxu0 %v438_v1  ;;  %v73_v12 = vld [vmem:[%s615_s0] sm:$0xff]  ;;  %v442_v16 = vld [vmem:[#allocation4 + $0x10] sm:$0xff]  ;;  %v441_v17 = vld [vmem:[#allocation4 + $0x8] sm:$0xff] }
  0x13   :  { %230 = vmatpush.bf16.msra.mxu1 %v446_v3  ;;  %v75_v14 = vpack.c.bf16 %v74_v13, %v73_v12  ;;  %v440_v18 = vld [vmem:[#allocation4] sm:$0xff]  ;;  %v455_v19 = vld [vmem:[#allocation6 + $0x38] sm:$0xff]  ;;  %v454_v20 = vld [vmem:[#allocation6 + $0x30] sm:$0xff] }
  0x14   :  { %314 = vmatpush.bf16.msra.mxu2 %v455_v19  ;;  %v453_v21 = vld [vmem:[#allocation6 + $0x28] sm:$0xff]  ;;  %v452_v22 = vld [vmem:[#allocation6 + $0x20] sm:$0xff]  ;;  %v451_v31 = vld [vmem:[#allocation6 + $0x18] sm:$0xff] }
  0x15   :  { %v461_v24 = vld [vmem:[%s617_s2] ss:$0 sm:$0xff]  ;;  %v450_v32 = vld [vmem:[#allocation6 + $0x10] sm:$0xff]  ;;  %v449_v33 = vld [vmem:[#allocation6 + $0x8] sm:$0xff] }
  0x16   :  { %146 = vmatpush.bf16.msra.mxu0 %v437_v4  ;;  %v448_v34 = vld [vmem:[#allocation6] sm:$0xff] }
  0x17   :  { %231 = vmatpush.bf16.msra.mxu1 %v445_v5  ;;  %v462_v36 = vld [vmem:[%s619_s4] ss:$0 sm:$0xff] }
  0x18   :  { %315 = vmatpush.bf16.msra.mxu2 %v454_v20  ;;  %v463_v43 = vld [vmem:[%s621_s6] ss:$0 sm:$0xff] }
  0x1a   :  { %147 = vmatpush.bf16.msra.mxu0 %v436_v6 }
  0x1b   :  { %232 = vmatpush.bf16.msra.mxu1 %v444_v7 }
  0x1c   :  { %316 = vmatpush.bf16.msra.mxu2 %v453_v21 }
  0x1e   :  { %148 = vmatpush.bf16.msra.mxu0 %v435_v8 }
  0x1f   :  { %233 = vmatpush.bf16.msra.mxu1 %v443_v15 }
  0x20   :  { %317 = vmatpush.bf16.msra.mxu2 %v452_v22 }
  0x22   :  { %149 = vmatpush.bf16.msra.mxu0 %v434_v9 }
  0x23   :  { %234 = vmatpush.bf16.msra.mxu1 %v442_v16 }
  0x24   :  { %318 = vmatpush.bf16.msra.mxu2 %v451_v31 }
  0x26   :  { %150 = vmatpush.bf16.msra.mxu0 %v433_v10 }
  0x27   :  { %235 = vmatpush.bf16.msra.mxu1 %v441_v17 }
  0x28   :  { %319 = vmatpush.bf16.msra.mxu2 %v450_v32 }
  0x2a   :  { %151 = vmatpush.bf16.msra.mxu0 %v432_v11 }
  0x2b   :  { %236 = vmatpush.bf16.msra.mxu1 %v440_v18 }
  0x2c   :  { %320 = vmatpush.bf16.msra.mxu2 %v449_v33 }
  0x2d   :  { %152 = vmatmul.bf16.vlgmr.msra.gmra.mxu0 %v75_v14 }
  0x30   :  { %321 = vmatpush.bf16.msra.mxu2 %v448_v34 }
  0xaa   :  { %v153_v23 = vpop.f32.mrf.mxu0 }
  0xab   :  { %v154_v25 = vadd.f32 %v461_v24, %v153_v23 }
  0xad   :  { %v158_v28 = vmax.f32 %v154_v25, 0.0 }
  0xb2   :  { %v155_v26 = vpop.f32.mrf.mxu0 }
  0xb3   :  { %v156_v27 = vadd.f32 %v461_v24, %v155_v26 }
  0xb5   :  { %v159_v29 = vmax.f32 %v156_v27, 0.0 }
  0xb7   :  { %v160_v30 = vpack.c.bf16 %v159_v29, %v158_v28 }
  0xb9   :  { %237 = vmatmul.bf16.vlgmr.msra.gmra.mxu1 %v160_v30 }
 0x136   :  { %v238_v35 = vpop.f32.mrf.mxu1 }
 0x137   :  { %v239_v37 = vadd.f32 %v462_v36, %v238_v35 }
 0x139   :  { %v243_v40 = vmax.f32 %v239_v37, 0.0 }
 0x13e   :  { %v240_v38 = vpop.f32.mrf.mxu1 }
 0x13f   :  { %v241_v39 = vadd.f32 %v462_v36, %v240_v38 }
 0x141   :  { %v244_v41 = vmax.f32 %v241_v39, 0.0 }
 0x143   :  { %v245_v42 = vpack.c.bf16 %v244_v41, %v243_v40 }
 0x145   :  { %322 = vmatmul.bf16.vlgmr.msra.gmra.mxu2 %v245_v42 }
 0x1c8   :  { %v323_v44 = vpop.f32.mrf.mxu2 }
 0x1c9   :  { %v324_v45 = vadd.f32 %v463_v43, %v323_v44 }
 0x1cb   :  { %328 = vst [vmem:[%s622_s7] sm:$0xff] %v324_v45 }
 0x1d0   :  { %v325_v46 = vpop.f32.mrf.mxu2 }
 0x1d1   :  { %v326_v47 = vadd.f32 %v463_v43, %v325_v46 }
 0x1d3   :  { %329 = vst [vmem:[%s622_s7 + $0x8] sm:$0xff] %v326_v47 }
 0x1d4   :  { %334 = vsyncpa [#allocation3], 1 }
 0x1d5   :  { %335 = vsyncpa [#allocation5], 1 }

</bundles_post_ra>
